<compile_context>
chip_gen: v5e
topology: v5e:2x2
jax: 0.10.0
libtpu: 0.0.40
codegen_flags: <defaults>
</compile_context>

<pallas_src>
import functools

import jax
import jax.numpy as jnp
from jax.experimental import pallas as pl
from jax.experimental.pallas import tpu as pltpu


def _bruteforce_kernel(xT_ref, w1t_ref, b1_ref, w2t_ref, b2_ref, c_ref,
                       out_ref):
    """One batch tile (batch on the lane axis).

    Writes dxs^T into rows 0..D-1 and -divergence into row D of out_ref.
    """
    xT = xT_ref[...]                                                  # [D, TB]

    # hidden pre-activation (time conditioning already folded into b1):
    #   h^T = W1^T x^T + (b1 + t*wt)
    hT = (jnp.dot(w1t_ref[...], xT, preferred_element_type=jnp.float32)
          + b1_ref[...])                                              # [H, TB]
    aT = jnp.tanh(hT)                                                 # [H, TB]

    # dynamics output, transposed:  dxs^T = W2^T a^T + b2
    dxsT = (jnp.dot(w2t_ref[...], aT, preferred_element_type=jnp.float32)
            + b2_ref[...])                                            # [D, TB]

    # exact divergence on the (otherwise idle) MXU:
    #   -div = -(c @ sech2^T),  c = diag(W2 @ W1)
    sech2T = 1.0 - aT * aT                                            # [H, TB]
    negdivT = -jnp.dot(c_ref[...], sech2T,
                       preferred_element_type=jnp.float32)            # [1, TB]

    d = dxsT.shape[0]
    out_ref[pl.ds(0, d), :] = dxsT          # rows 0..D-1 : dxs^T
    out_ref[pl.ds(d, 1), :] = negdivT       # row  D      : -divergence


def _pick_tile_mult(m, tile_mult):
    """Largest divisor of m (batch size in units of 128 lanes) that is
    <= tile_mult, while leaving >= 2 (preferably an even number of) grid
    steps when possible so the 'parallel' batch axis can shard across both
    TensorCores on v7x."""
    cand = max(1, min(int(tile_mult), m))
    if m >= 2:
        cand = max(1, min(cand, m // 2))
    divs = [d for d in range(1, cand + 1) if m % d == 0]
    best = max(divs)
    even = [d for d in divs if (m // d) % 2 == 0]
    if even and 2 * max(even) >= best:
        best = max(even)
    return best


@functools.partial(jax.jit, static_argnames=("tile_b",))
def brute_force_estimator_fast(t, xs, w1, b1, wt, w2, b2, *, tile_b=4096):
    B, D = xs.shape
    H = w1.shape[1]

    # ---- one-time parameter / layout glue (tiny, outside the kernel) -------
    # fold scalar-time conditioning into the bias:  h = x @ W1 + (b1 + t*wt)
    b1_eff = (b1 + jnp.asarray(t, jnp.float32) * wt).reshape(H, 1)
    b2_col = b2.reshape(D, 1)
    # c_k = sum_i W2[k, i] * W1[i, k] = diag(W2 @ W1)  -> exact trace weights
    c_row = jnp.sum(w2 * w1.T, axis=1).reshape(1, H)
    w1T = w1.T                                   # [H, D]
    w2T = w2.T                                   # [D, H]

    # ---- batch tiling -------------------------------------------------------
    # pad the batch to a multiple of 128 only (waste <= 127 rows); choose the
    # tile as a divisor of the 128-padded batch (in multiples of 128 lanes).
    Bp = -(-B // 128) * 128
    m = Bp // 128
    tb = 128 * _pick_tile_mult(m, max(1, int(tile_b) // 128))

    # pad + transpose in a single expression so XLA fuses them into one copy;
    # batch lands on the lane axis -> lane-dense kernel loads and stores.
    xT = jnp.pad(xs.astype(jnp.float32), ((0, Bp - B), (0, 0))).T    # [D, Bp]

    grid = (Bp // tb,)
    out = pl.pallas_call(
        _bruteforce_kernel,
        out_shape=jax.ShapeDtypeStruct((D + 1, Bp), jnp.float32),
        grid_spec=pltpu.PrefetchScalarGridSpec(
            num_scalar_prefetch=0,
            grid=grid,
            in_specs=[
                # NOTE: if the strided x^T row DMA ever shows up exposed in a
                # profile, add pipeline_mode=pl.Buffered(3) to this spec.
                pl.BlockSpec((D, tb), lambda i: (0, i)),   # xs^T
                pl.BlockSpec((H, D), lambda i: (0, 0)),    # W1^T
                pl.BlockSpec((H, 1), lambda i: (0, 0)),    # b1 + t*wt
                pl.BlockSpec((D, H), lambda i: (0, 0)),    # W2^T
                pl.BlockSpec((D, 1), lambda i: (0, 0)),    # b2
                pl.BlockSpec((1, H), lambda i: (0, 0)),    # c = diag(W2@W1)
            ],
            out_specs=pl.BlockSpec((D + 1, tb), lambda i: (0, i)),  # [dxs^T;-div]
        ),
        compiler_params=pltpu.CompilerParams(
            dimension_semantics=("parallel",)),
    )(xT, w1T, b1_eff, w2T, b2_col, c_row)

    # strip padding and return in the PyTorch [n_batch, system_dim] convention
    # (callers that keep the transposed layout can consume `out` directly and
    # skip these two relayout passes entirely).
    dxs = out[:D, :B].T                          # [B, D]
    neg_div = out[D:, :B].T                      # [B, 1]
    return dxs, neg_div


def _dynamics_ref(t, x, w1, b1, wt, w2, b2):
    """Pure-JAX reference of the concrete dynamics function."""
    h = x @ w1 + t * wt + b1
    return jnp.tanh(h) @ w2 + b2


def _reference(t, xs, w1, b1, wt, w2, b2):
    """What brute-force autograd (trace of the Jacobian) would produce."""
    ref_dxs = _dynamics_ref(t, xs, w1, b1, wt, w2, b2)
    jac = jax.vmap(jax.jacfwd(
        lambda xb: _dynamics_ref(t, xb[None, :], w1, b1, wt, w2, b2)[0]))(xs)
    ref_neg_div = -jnp.trace(jac, axis1=1, axis2=2).reshape(-1, 1)
    return ref_dxs, ref_neg_div


if __name__ == "__main__":
    D, H = 8, 32   # system_dim, hidden

    key = jax.random.PRNGKey(0)
    k_x, k_w1, k_b1, k_wt, k_w2, k_b2, k_x2 = jax.random.split(key, 7)

    t = jnp.float32(0.5)
    w1 = jax.random.normal(k_w1, (D, H), dtype=jnp.float32) / jnp.sqrt(D)
    b1 = jax.random.normal(k_b1, (H,), dtype=jnp.float32) * 0.1
    wt = jax.random.normal(k_wt, (H,), dtype=jnp.float32) * 0.1
    w2 = jax.random.normal(k_w2, (H, D), dtype=jnp.float32) / jnp.sqrt(H)
    b2 = jax.random.normal(k_b2, (D,), dtype=jnp.float32) * 0.1

    # --- small batch: single 128-padded tile, grid=(1,) ----------------------
    B = 8
    xs = jax.random.normal(k_x, (B, D), dtype=jnp.float32)
    dxs, neg_div = brute_force_estimator_fast(t, xs, w1, b1, wt, w2, b2)
    jax.block_until_ready((dxs, neg_div))
    ref_dxs, ref_neg_div = _reference(t, xs, w1, b1, wt, w2, b2)
    assert dxs.shape == (B, D) and neg_div.shape == (B, 1)
    assert jnp.allclose(dxs, ref_dxs, atol=1e-5, rtol=1e-5)
    assert jnp.allclose(neg_div, ref_neg_div, atol=1e-5, rtol=1e-5)

    # --- ragged batch: exercises 128-granular padding + multi-step grid ------
    B2 = 200
    xs2 = jax.random.normal(k_x2, (B2, D), dtype=jnp.float32)
    dxs2, neg_div2 = brute_force_estimator_fast(t, xs2, w1, b1, wt, w2, b2)
    jax.block_until_ready((dxs2, neg_div2))
    ref_dxs2, ref_neg_div2 = _reference(t, xs2, w1, b1, wt, w2, b2)
    assert dxs2.shape == (B2, D) and neg_div2.shape == (B2, 1)
    assert jnp.allclose(dxs2, ref_dxs2, atol=1e-5, rtol=1e-5)
    assert jnp.allclose(neg_div2, ref_neg_div2, atol=1e-5, rtol=1e-5)

    print("KERNEL_OK")
</pallas_src>

<mosaic_0001>
module attributes {stable_mosaic.version = 11 : i64} {
  func.func @_bruteforce_kernel(%arg0: i32, %arg1: memref<8x128xf32, #tpu.memory_space<vmem>>, %arg2: memref<32x8xf32, #tpu.memory_space<vmem>>, %arg3: memref<32x1xf32, #tpu.memory_space<vmem>>, %arg4: memref<8x32xf32, #tpu.memory_space<vmem>>, %arg5: memref<8x1xf32, #tpu.memory_space<vmem>>, %arg6: memref<1x32xf32, #tpu.memory_space<vmem>>, %arg7: memref<9x128xf32, #tpu.memory_space<vmem>>) attributes {dimension_semantics = [#tpu.dimension_semantics<parallel>], iteration_bounds = array<i64: 1>, scalar_prefetch = 0 : i64, scratch_operands = 0 : i64, tpu.core_type = #tpu.core_type<tc>, window_params = [{transform_indices = @transform_0, window_bounds = array<i64: 8, 128>}, {pipeline_mode = #tpu.pipeline_mode<synchronous>, transform_indices = @transform_1, window_bounds = array<i64: 32, 8>}, {pipeline_mode = #tpu.pipeline_mode<synchronous>, transform_indices = @transform_2, window_bounds = array<i64: 32, 1>}, {pipeline_mode = #tpu.pipeline_mode<synchronous>, transform_indices = @transform_3, window_bounds = array<i64: 8, 32>}, {pipeline_mode = #tpu.pipeline_mode<synchronous>, transform_indices = @transform_4, window_bounds = array<i64: 8, 1>}, {pipeline_mode = #tpu.pipeline_mode<synchronous>, transform_indices = @transform_5, window_bounds = array<i64: 1, 32>}, {transform_indices = @transform_6, window_bounds = array<i64: 9, 128>}]} {
    %c0 = arith.constant 0 : index
    %c0_0 = arith.constant 0 : index
    %0 = vector.load %arg1[%c0, %c0_0] : memref<8x128xf32, #tpu.memory_space<vmem>>, vector<8x128xf32>
    %c0_1 = arith.constant 0 : index
    %c0_2 = arith.constant 0 : index
    %1 = vector.load %arg2[%c0_1, %c0_2] : memref<32x8xf32, #tpu.memory_space<vmem>>, vector<32x8xf32>
    %cst = arith.constant dense<0.000000e+00> : vector<32x128xf32>
    %2 = tpu.matmul %1, %0, %cst {dimension_numbers = #tpu.dot_dimension_numbers<[1], [0], [0], [1], [0, 0, 1, 1], [], []>} : vector<32x8xf32>, vector<8x128xf32>, vector<32x128xf32> -> vector<32x128xf32>
    %c0_3 = arith.constant 0 : index
    %c0_4 = arith.constant 0 : index
    %3 = vector.load %arg3[%c0_3, %c0_4] : memref<32x1xf32, #tpu.memory_space<vmem>>, vector<32x1xf32>
    %4 = vector.broadcast %3 : vector<32x1xf32> to vector<32x128xf32>
    %5 = arith.addf %2, %4 : vector<32x128xf32>
    %6 = math.tanh %5 : vector<32x128xf32>
    %c0_5 = arith.constant 0 : index
    %c0_6 = arith.constant 0 : index
    %7 = vector.load %arg4[%c0_5, %c0_6] : memref<8x32xf32, #tpu.memory_space<vmem>>, vector<8x32xf32>
    %cst_7 = arith.constant dense<0.000000e+00> : vector<8x128xf32>
    %8 = tpu.matmul %7, %6, %cst_7 {dimension_numbers = #tpu.dot_dimension_numbers<[1], [0], [0], [1], [0, 0, 1, 1], [], []>} : vector<8x32xf32>, vector<32x128xf32>, vector<8x128xf32> -> vector<8x128xf32>
    %c0_8 = arith.constant 0 : index
    %c0_9 = arith.constant 0 : index
    %9 = vector.load %arg5[%c0_8, %c0_9] : memref<8x1xf32, #tpu.memory_space<vmem>>, vector<8x1xf32>
    %10 = vector.broadcast %9 : vector<8x1xf32> to vector<8x128xf32>
    %11 = arith.addf %8, %10 : vector<8x128xf32>
    %12 = arith.mulf %6, %6 : vector<32x128xf32>
    %cst_10 = arith.constant 1.000000e+00 : f32
    %13 = vector.broadcast %cst_10 : f32 to vector<32x128xf32>
    %14 = arith.subf %13, %12 : vector<32x128xf32>
    %c0_11 = arith.constant 0 : index
    %c0_12 = arith.constant 0 : index
    %15 = vector.load %arg6[%c0_11, %c0_12] : memref<1x32xf32, #tpu.memory_space<vmem>>, vector<1x32xf32>
    %cst_13 = arith.constant dense<0.000000e+00> : vector<1x128xf32>
    %16 = tpu.matmul %15, %14, %cst_13 {dimension_numbers = #tpu.dot_dimension_numbers<[1], [0], [0], [1], [0, 0, 1, 1], [], []>} : vector<1x32xf32>, vector<32x128xf32>, vector<1x128xf32> -> vector<1x128xf32>
    %cst_14 = arith.constant 0.000000e+00 : f32
    %17 = vector.broadcast %cst_14 : f32 to vector<1x128xf32>
    %18 = arith.subf %17, %16 : vector<1x128xf32>
    %c0_15 = arith.constant 0 : index
    %c0_16 = arith.constant 0 : index
    %19 = vector.load %arg7[%c0_15, %c0_16] : memref<9x128xf32, #tpu.memory_space<vmem>>, vector<8x128xf32>
    tpu.vector_store %arg7[%c0_15, %c0_16], %11 {strides = array<i32>} : memref<9x128xf32, #tpu.memory_space<vmem>>, vector<8x128xf32>,
    %c8 = arith.constant 8 : index
    %c0_17 = arith.constant 0 : index
    %20 = vector.load %arg7[%c8, %c0_17] : memref<9x128xf32, #tpu.memory_space<vmem>>, vector<1x128xf32>
    tpu.vector_store %arg7[%c8, %c0_17], %18 {strides = array<i32>} : memref<9x128xf32, #tpu.memory_space<vmem>>, vector<1x128xf32>,
    return
  }
  func.func @transform_0(%arg0: i32) -> (i32, i32) {
    %c0_i32 = arith.constant 0 : i32
    %c0_i32_0 = arith.constant 0 : i32
    return %c0_i32, %arg0 : i32, i32
  }
  func.func @transform_1(%arg0: i32) -> (i32, i32) {
    %c0_i32 = arith.constant 0 : i32
    %c0_i32_0 = arith.constant 0 : i32
    %c0_i32_1 = arith.constant 0 : i32
    return %c0_i32, %c0_i32_0 : i32, i32
  }
  func.func @transform_2(%arg0: i32) -> (i32, i32) {
    %c0_i32 = arith.constant 0 : i32
    %c0_i32_0 = arith.constant 0 : i32
    %c0_i32_1 = arith.constant 0 : i32
    return %c0_i32, %c0_i32_0 : i32, i32
  }
  func.func @transform_3(%arg0: i32) -> (i32, i32) {
    %c0_i32 = arith.constant 0 : i32
    %c0_i32_0 = arith.constant 0 : i32
    %c0_i32_1 = arith.constant 0 : i32
    return %c0_i32, %c0_i32_0 : i32, i32
  }
  func.func @transform_4(%arg0: i32) -> (i32, i32) {
    %c0_i32 = arith.constant 0 : i32
    %c0_i32_0 = arith.constant 0 : i32
    %c0_i32_1 = arith.constant 0 : i32
    return %c0_i32, %c0_i32_0 : i32, i32
  }
  func.func @transform_5(%arg0: i32) -> (i32, i32) {
    %c0_i32 = arith.constant 0 : i32
    %c0_i32_0 = arith.constant 0 : i32
    %c0_i32_1 = arith.constant 0 : i32
    return %c0_i32, %c0_i32_0 : i32, i32
  }
  func.func @transform_6(%arg0: i32) -> (i32, i32) {
    %c0_i32 = arith.constant 0 : i32
    %c0_i32_0 = arith.constant 0 : i32
    return %c0_i32, %arg0 : i32, i32
  }
}

</mosaic_0001>

<bundles_post_ra>
// kernel: brute_force_estimator_fast.1
= control target key start
LH: loop header
LB: loop body
LE: loop exit
PB: predicated region body
PF: predicated region fallthrough
CT: control target
= control target key end

     0   :  { %vm52_vm0 = vcmask 64512   ;;  %v187_v3 = vmov 0   ;;  %vm105_vm1 = vcmask 261120   ;;  %s269_s0 = inlined_call_operand.vmem [shape: f32[8,128], index: 0, kind: input, shape index: {}]   ;;  %s270_s1 = inlined_call_operand.vmem [shape: f32[32,8], index: 1, kind: input, shape index: {}]   ;;  %s271_s2 = inlined_call_operand.vmem [shape: f32[32,1], index: 2, kind: input, shape index: {}]   ;;  %s272_s4 = inlined_call_operand.vmem [shape: f32[8,1], index: 4, kind: input, shape index: {}]   ;;  %s273_s3 = inlined_call_operand.vmem [shape: f32[8,32], index: 3, kind: input, shape index: {}]   ;;  %s274_s5 = inlined_call_operand.vmem [shape: f32[1,32], index: 5, kind: input, shape index: {}]   ;;  %s275_s6 = inlined_call_operand.vmem [shape: f32[9,128], index: 6, kind: output, shape index: {}]  }
   0x1   :  { %v23_v0 = vld [vmem:[%s269_s0] sm:$0xff]  ;;  %v26_v1 = vld [vmem:[%s270_s1 + $0x10] sm:$0xff]  ;;  %176 = vset.pattern.permute.xlu0 %v187_v3  ;;  %177 = vset.pattern.permute.xlu1 %v187_v3  ;;  %v31_v4 = vld [vmem:[%s271_s2 + $0x18] sm:$0xff] }
   0x2   :  { %v24_v2 = vld [vmem:[%s270_s1] sm:$0xff]  ;;  %174 = vmatpush.msra.mxu3 %v23_v0  ;;  %80 = vmatpush.msra.mxu0 %v23_v0  ;;  %v29_v5 = vld [vmem:[%s271_s2 + $0x8] sm:$0xff]  ;;  %v27_v6 = vld [vmem:[%s270_s1 + $0x18] sm:$0xff] }
   0x3   :  { %170 = vmatmul.msk.f32.vlgmr.msra.gmra.mxu3 %vm52_vm0, %v26_v1  ;;  %168 = vmatmul.msk.f32.vlgmr.msra.gmra.mxu0 %vm52_vm0, %v24_v2  ;;  %v25_v7 = vld [vmem:[%s270_s1 + $0x8] sm:$0xff]  ;;  %v30_v8 = vld [vmem:[%s271_s2 + $0x10] sm:$0xff]  ;;  %v28_v9 = vld [vmem:[%s271_s2] sm:$0xff] }
   0x4   :  { %49 = vperm.xlu0 %176, %v31_v4   ;;  %39 = vperm.xlu1 %177, %v29_v5   ;;  %v99_v13 = vld [vmem:[%s272_s4] sm:$0xff] }
   0x5   :  { %178 = vset.pattern.permute.xlu2 %v187_v3  ;;  %v98_v33 = vld [vmem:[%s273_s3] sm:$0xff] }
   0x6   :  { %102 = vperm.xlu2 %178, %v99_v13   ;;  %v137_v36 = vld [vmem:[%s274_s5] sm:$0x1] }
   0xb   :  { %171 = vmatmul.msk.f32.gmra.mxu3 %vm52_vm0, %v27_v6  ;;  %169 = vmatmul.msk.f32.gmra.mxu0 %vm52_vm0, %v25_v7 }
   0xc   :  { %44 = vperm.xlu0 %176, %v30_v8   ;;  %34 = vperm.xlu1 %177, %v28_v9  }
  0x60   :  { %v103_v37 = vpop.permute.xlu2 %102 }
  0x76   :  { %v50_v10 = vpop.permute.xlu0 %49  ;;  %v40_v12 = vpop.permute.xlu1 %39 }
  0x7e   :  { %v45_v15 = vpop.permute.xlu0 %44  ;;  %v35_v18 = vpop.permute.xlu1 %34 }
  0x80   :  { %v82_v11 = vpop.f32.mrf.mxu0 }
  0x81   :  { %v83_v21 = vadd.f32 %v82_v11, %v35_v18 }
  0x86   :  { %v88_v14 = vpop.f32.mrf.mxu3 }
  0x87   :  { %v89_v17 = vadd.f32 %v88_v14, %v45_v15 }
  0x88   :  { %v85_v16 = vpop.f32.mrf.mxu0 }
  0x89   :  { %v86_v19 = vadd.f32 %v85_v16, %v40_v12  ;;  %179 = vtanh.f32 %v89_v17 }
  0x8b   :  { %181 = vtanh.f32 %v86_v19 }
  0x8e   :  { %v91_v20 = vpop.f32.mrf.mxu3 }
  0x8f   :  { %v92_v22 = vadd.f32 %v91_v20, %v50_v10  ;;  %v180_v23 = vpop.eup %179 }
  0x90   :  { %v131_v27 = vmul.f32 %v180_v23, %v180_v23 }
  0x91   :  { %183 = vtanh.f32 %v92_v22  ;;  %v182_v24 = vpop.eup %181 }
  0x92   :  { %185 = vtanh.f32 %v83_v21  ;;  %v130_v30 = vmul.f32 %v182_v24, %v182_v24  ;;  %v135_v31 = vsub.f32 1.0, %v131_v27 }
  0x94   :  { %v134_v34 = vsub.f32 1.0, %v130_v30 }
  0x97   :  { %v184_v25 = vpop.eup %183 }
  0x98   :  { %121 = vmatpush.msra.mxu1 %v184_v25  ;;  %v132_v26 = vmul.f32 %v184_v25, %v184_v25  ;;  %v186_v28 = vpop.eup %185 }
  0x99   :  { %v129_v32 = vmul.f32 %v186_v28, %v186_v28 }
  0x9a   :  { %122 = vmatpush.msra.mxu1 %v180_v23  ;;  %v136_v29 = vsub.f32 1.0, %v132_v26 }
  0x9b   :  { %v133_v35 = vsub.f32 1.0, %v129_v32 }
  0x9c   :  { %123 = vmatpush.msra.mxu1 %v182_v24  ;;  %153 = vmatpush.msra.mxu2 %v136_v29 }
  0x9e   :  { %124 = vmatpush.msra.mxu1 %v186_v28  ;;  %154 = vmatpush.msra.mxu2 %v135_v31 }
  0x9f   :  { %172 = vmatmul.msk.f32.vlgmr.msra.gmra.mxu1 %vm105_vm1, %v98_v33 }
  0xa0   :  { %155 = vmatpush.msra.mxu2 %v134_v34 }
  0xa2   :  { %156 = vmatpush.msra.mxu2 %v133_v35 }
  0xa3   :  { %173 = vmatmul.msk.f32.vlgmr.msra.gmra.mxu2 %vm105_vm1, %v137_v36 }
 0x11c   :  { %v126_v38 = vpop.f32.mrf.mxu1 }
 0x11d   :  { %v127_v39 = vadd.f32 %v126_v38, %v103_v37 }
 0x11f   :  { %162 = vst [vmem:[%s275_s6] sm:$0xff] %v127_v39 }
 0x126   :  { %v158_v40 = vpop.f32.mrf.mxu2 }
 0x127   :  { %v161_v41 = vsub.f32 0.0, %v158_v40 }
 0x129   :  { %163 = vst [vmem:[%s275_s6 + $0x8] sm:$0x1] %v161_v41 }

</bundles_post_ra>
